<compile_context>
chip_gen: v7x
topology: tpu7x:2x2x1
jax: 0.10.0
libtpu: 0.0.40
codegen_flags: <defaults>
</compile_context>

<pallas_src>
import functools

import jax
import jax.numpy as jnp
from jax.experimental import pallas as pl
from jax.experimental.pallas import tpu as pltpu

_LANE = 128  # vreg lane width; used only for VMEM budgeting (lane padding).


def _fused_mlp_kernel(*refs, num_hidden_layers):
    """Fully fused MLP for one batch tile.

    refs = (x_ref, w0, b0, w1, b1, ..., wL, bL, o_ref).
    Hidden layers get ReLU; the final (output) layer does not.
    Intermediates live entirely on-chip (VMEM/vregs) — no HBM round-trips.
    """
    x_ref, o_ref = refs[0], refs[-1]
    wb_refs = refs[1:-1]
    n_layers = len(wb_refs) // 2

    h = x_ref[...]
    for idx in range(n_layers):
        w = wb_refs[2 * idx][...]
        b = wb_refs[2 * idx + 1][...]
        # MXU matmul with f32 accumulation; bias add / ReLU on the VPU in f32.
        # (bf16 path: h is re-quantized to bf16 here before each matmul.)
        h = jnp.dot(h.astype(w.dtype), w, preferred_element_type=jnp.float32)
        h = h + b.astype(jnp.float32)      # (bt, Dout) + (1, Dout)
        if idx < num_hidden_layers:
            h = jnp.maximum(h, 0.0)
    o_ref[...] = h.astype(o_ref.dtype)


def mlp_block_forward(x, params, num_hidden_layers, *, batch_tile=8192,
                      out_dtype=None):
    """MLP_Block.forward as one fused, batch-tiled pallas_call.

    x: (B, Din).  params: list of (W (din, dout), b (1, dout)).
    """
    B, Din = x.shape
    Dout = params[-1][0].shape[1]
    out_dtype = out_dtype if out_dtype is not None else x.dtype

    # ---- batch-tile selection (multiple of 8 sublanes, VMEM-safe) ----------
    bt = min(batch_tile, max(B, 8))
    bt = max(8, (bt // 8) * 8)
    # Give the v7x megacore ("parallel" batch axis) at least 2 grid steps when
    # the batch is large enough that the extra per-step overhead is noise.
    if B >= 2048 and pl.cdiv(B, bt) < 2:
        bt = max(8, ((-(-B // 2)) // 8) * 8)
    grid = (pl.cdiv(B, bt),)  # ragged last block handled by Pallas (no pad).

    # ---- specs / flat params ------------------------------------------------
    flat_params = []
    in_specs = [pl.BlockSpec((bt, Din), lambda i: (i, 0))]
    w_bytes = 0
    for (w, b) in params:
        din, dout = w.shape
        flat_params += [w, b]
        w_bytes += w.size * w.dtype.itemsize + b.size * b.dtype.itemsize
        # Constant index_map -> each weight/bias tile is DMA'd once and stays
        # VMEM-resident across all batch tiles (the pipeline skips re-fetch of
        # unchanged block indices).  Total weights < 20 KiB even in f32.
        in_specs += [
            pl.BlockSpec((din, dout), lambda i: (0, 0)),
            pl.BlockSpec((1, dout), lambda i: (0, 0)),
        ]

    # ---- cost estimate (lets XLA overlap this kernel with neighbors) -------
    x_item = jnp.dtype(x.dtype).itemsize
    o_item = jnp.dtype(out_dtype).itemsize
    flops = 2 * B * sum(w.shape[0] * w.shape[1] for (w, _) in params)
    bytes_accessed = B * Din * x_item + B * Dout * o_item + w_bytes
    cost = pl.CostEstimate(flops=flops, transcendentals=0,
                           bytes_accessed=bytes_accessed)

    # ---- explicit scoped-VMEM budget ----------------------------------------
    # Double-buffered, lane-padded x and out tiles + f32 intermediates /
    # Mosaic temporaries for the fused 3-layer chain + resident weights.
    vmem_bytes = (2 * bt * _LANE * x_item          # x tiles (double-buffered)
                  + 2 * bt * _LANE * o_item        # out tiles (double-buffered)
                  + 4 * bt * _LANE * 4             # f32 intermediates headroom
                  + w_bytes + (1 << 20))           # weights + slack
    vmem_limit = int(min(max(vmem_bytes, 16 << 20), 64 << 20))  # v7x-safe cap

    kernel = functools.partial(_fused_mlp_kernel,
                               num_hidden_layers=num_hidden_layers)

    return pl.pallas_call(
        kernel,
        out_shape=jax.ShapeDtypeStruct((B, Dout), out_dtype),
        grid=grid,
        in_specs=in_specs,
        out_specs=pl.BlockSpec((bt, Dout), lambda i: (i, 0)),
        compiler_params=pltpu.CompilerParams(
            # Batch tiles are independent -> shard across both TCs on v7x.
            dimension_semantics=("parallel",),
            vmem_limit_bytes=vmem_limit,
        ),
        cost_estimate=cost,
    )(x, *flat_params)


def init_mlp_params(key, input_dim, hidden_units, output_dim,
                    dtype=jnp.bfloat16):
    """Init mimicking nn.Linear's uniform(-1/sqrt(fan_in), ...).

    Weights are returned PRE-TRANSPOSED as (in_features, out_features)
    (PyTorch nn.Linear stores (out, in)).  bf16 is the preferred operand
    dtype for this HBM-bound kernel (f32 accumulation inside the kernel).
    """
    dims = [input_dim] + list(hidden_units) + ([output_dim] if output_dim else [])
    params = []
    for i in range(len(dims) - 1):
        fan_in, fan_out = dims[i], dims[i + 1]
        key, kw, kb = jax.random.split(key, 3)
        bound = 1.0 / (fan_in ** 0.5)
        w = jax.random.uniform(kw, (fan_in, fan_out), jnp.float32, -bound, bound)
        b = jax.random.uniform(kb, (1, fan_out), jnp.float32, -bound, bound)
        params.append((w.astype(dtype), b.astype(dtype)))
    return params


def mlp_block_reference(x, params, num_hidden_layers):
    """Plain-JAX f32 reference for correctness checking."""
    h = x.astype(jnp.float32)
    for idx, (w, b) in enumerate(params):
        h = h @ w.astype(jnp.float32) + b.astype(jnp.float32)[0]
        if idx < num_hidden_layers:
            h = jnp.maximum(h, 0.0)
    return h


if __name__ == "__main__":
    input_dim = 32
    hidden_units = [64, 32]
    output_dim = 16
    num_hidden = len(hidden_units)
    batch = 8

    key = jax.random.PRNGKey(0)
    key, kx = jax.random.split(key)
    x = jax.random.normal(kx, (batch, input_dim), jnp.float32)

    # --- f32 path (exact check against the reference) ---
    params_f32 = init_mlp_params(key, input_dim, hidden_units, output_dim,
                                 dtype=jnp.float32)
    out_f32 = jax.block_until_ready(
        mlp_block_forward(x, params_f32, num_hidden))
    ref = mlp_block_reference(x, params_f32, num_hidden)
    assert out_f32.shape == (batch, output_dim)
    assert jnp.allclose(out_f32, ref, atol=1e-5, rtol=1e-5), \
        "f32 mismatch vs reference"

    # --- ragged batch (B not a multiple of the tile): exercises the no-pad
    #     pl.cdiv grid with a masked last block ---
    batch_ragged = 12
    key, kr = jax.random.split(key)
    xr = jax.random.normal(kr, (batch_ragged, input_dim), jnp.float32)
    out_r = jax.block_until_ready(
        mlp_block_forward(xr, params_f32, num_hidden, batch_tile=8))
    ref_r = mlp_block_reference(xr, params_f32, num_hidden)
    assert out_r.shape == (batch_ragged, output_dim)
    assert jnp.allclose(out_r, ref_r, atol=1e-5, rtol=1e-5), \
        "ragged-batch mismatch vs reference"

    # --- bf16 operand path (default dtype; halves HBM traffic, f32 MXU acc) ---
    params_bf16 = [(w.astype(jnp.bfloat16), b.astype(jnp.bfloat16))
                   for (w, b) in params_f32]
    out_bf16 = jax.block_until_ready(
        mlp_block_forward(x.astype(jnp.bfloat16), params_bf16, num_hidden))
    assert out_bf16.shape == (batch, output_dim)
    assert out_bf16.dtype == jnp.bfloat16
    assert jnp.allclose(out_bf16.astype(jnp.float32), ref, atol=5e-2, rtol=5e-2), \
        "bf16 mismatch vs f32 reference"

    # TODO(synk): train-mode dropout and the optional BatchNorm1d branches of
    # MLP_Block are not exercised by this config (inference, batch_norm=False).
    print("KERNEL_OK")
</pallas_src>

<mosaic_0001>
module attributes {stable_mosaic.version = 11 : i64} {
  func.func @_fused_mlp_kernel(%arg0: i32, %arg1: memref<8x32xf32, #tpu.memory_space<vmem>>, %arg2: memref<32x64xf32, #tpu.memory_space<vmem>>, %arg3: memref<1x64xf32, #tpu.memory_space<vmem>>, %arg4: memref<64x32xf32, #tpu.memory_space<vmem>>, %arg5: memref<1x32xf32, #tpu.memory_space<vmem>>, %arg6: memref<32x16xf32, #tpu.memory_space<vmem>>, %arg7: memref<1x16xf32, #tpu.memory_space<vmem>>, %arg8: memref<8x16xf32, #tpu.memory_space<vmem>>) attributes {dimension_semantics = [#tpu.dimension_semantics<parallel>], iteration_bounds = array<i64: 1>, scalar_prefetch = 0 : i64, scratch_operands = 0 : i64, tpu.core_type = #tpu.core_type<tc>, window_params = [{transform_indices = @transform_0, window_bounds = array<i64: 8, 32>}, {pipeline_mode = #tpu.pipeline_mode<synchronous>, transform_indices = @transform_1, window_bounds = array<i64: 32, 64>}, {pipeline_mode = #tpu.pipeline_mode<synchronous>, transform_indices = @transform_2, window_bounds = array<i64: 1, 64>}, {pipeline_mode = #tpu.pipeline_mode<synchronous>, transform_indices = @transform_3, window_bounds = array<i64: 64, 32>}, {pipeline_mode = #tpu.pipeline_mode<synchronous>, transform_indices = @transform_4, window_bounds = array<i64: 1, 32>}, {pipeline_mode = #tpu.pipeline_mode<synchronous>, transform_indices = @transform_5, window_bounds = array<i64: 32, 16>}, {pipeline_mode = #tpu.pipeline_mode<synchronous>, transform_indices = @transform_6, window_bounds = array<i64: 1, 16>}, {transform_indices = @transform_7, window_bounds = array<i64: 8, 16>}]} {
    %c0 = arith.constant 0 : index
    %c0_0 = arith.constant 0 : index
    %0 = vector.load %arg1[%c0, %c0_0] : memref<8x32xf32, #tpu.memory_space<vmem>>, vector<8x32xf32>
    %c0_1 = arith.constant 0 : index
    %c0_2 = arith.constant 0 : index
    %1 = vector.load %arg2[%c0_1, %c0_2] : memref<32x64xf32, #tpu.memory_space<vmem>>, vector<32x64xf32>
    %c0_3 = arith.constant 0 : index
    %c0_4 = arith.constant 0 : index
    %2 = vector.load %arg3[%c0_3, %c0_4] : memref<1x64xf32, #tpu.memory_space<vmem>>, vector<1x64xf32>
    %cst = arith.constant dense<0.000000e+00> : vector<8x64xf32>
    %3 = tpu.matmul %0, %1, %cst {dimension_numbers = #tpu.dot_dimension_numbers<[1], [0], [0], [1], [0, 0, 1, 1], [], []>} : vector<8x32xf32>, vector<32x64xf32>, vector<8x64xf32> -> vector<8x64xf32>
    %4 = vector.broadcast %2 : vector<1x64xf32> to vector<8x64xf32>
    %5 = arith.addf %3, %4 : vector<8x64xf32>
    %cst_5 = arith.constant 0.000000e+00 : f32
    %6 = vector.broadcast %cst_5 : f32 to vector<8x64xf32>
    %7 = arith.maximumf %5, %6 : vector<8x64xf32>
    %c0_6 = arith.constant 0 : index
    %c0_7 = arith.constant 0 : index
    %8 = vector.load %arg4[%c0_6, %c0_7] : memref<64x32xf32, #tpu.memory_space<vmem>>, vector<64x32xf32>
    %c0_8 = arith.constant 0 : index
    %c0_9 = arith.constant 0 : index
    %9 = vector.load %arg5[%c0_8, %c0_9] : memref<1x32xf32, #tpu.memory_space<vmem>>, vector<1x32xf32>
    %cst_10 = arith.constant dense<0.000000e+00> : vector<8x32xf32>
    %10 = tpu.matmul %7, %8, %cst_10 {dimension_numbers = #tpu.dot_dimension_numbers<[1], [0], [0], [1], [0, 0, 1, 1], [], []>} : vector<8x64xf32>, vector<64x32xf32>, vector<8x32xf32> -> vector<8x32xf32>
    %11 = vector.broadcast %9 : vector<1x32xf32> to vector<8x32xf32>
    %12 = arith.addf %10, %11 : vector<8x32xf32>
    %cst_11 = arith.constant 0.000000e+00 : f32
    %13 = vector.broadcast %cst_11 : f32 to vector<8x32xf32>
    %14 = arith.maximumf %12, %13 : vector<8x32xf32>
    %c0_12 = arith.constant 0 : index
    %c0_13 = arith.constant 0 : index
    %15 = vector.load %arg6[%c0_12, %c0_13] : memref<32x16xf32, #tpu.memory_space<vmem>>, vector<32x16xf32>
    %c0_14 = arith.constant 0 : index
    %c0_15 = arith.constant 0 : index
    %16 = vector.load %arg7[%c0_14, %c0_15] : memref<1x16xf32, #tpu.memory_space<vmem>>, vector<1x16xf32>
    %cst_16 = arith.constant dense<0.000000e+00> : vector<8x16xf32>
    %17 = tpu.matmul %14, %15, %cst_16 {dimension_numbers = #tpu.dot_dimension_numbers<[1], [0], [0], [1], [0, 0, 1, 1], [], []>} : vector<8x32xf32>, vector<32x16xf32>, vector<8x16xf32> -> vector<8x16xf32>
    %18 = vector.broadcast %16 : vector<1x16xf32> to vector<8x16xf32>
    %19 = arith.addf %17, %18 : vector<8x16xf32>
    %c0_17 = arith.constant 0 : index
    %c0_18 = arith.constant 0 : index
    %20 = vector.load %arg8[%c0_17, %c0_18] : memref<8x16xf32, #tpu.memory_space<vmem>>, vector<8x16xf32>
    tpu.vector_store %arg8[%c0_17, %c0_18], %19 {strides = array<i32>} : memref<8x16xf32, #tpu.memory_space<vmem>>, vector<8x16xf32>,
    return
  }
  func.func @transform_0(%arg0: i32) -> (i32, i32) {
    %c0_i32 = arith.constant 0 : i32
    %c0_i32_0 = arith.constant 0 : i32
    return %arg0, %c0_i32 : i32, i32
  }
  func.func @transform_1(%arg0: i32) -> (i32, i32) {
    %c0_i32 = arith.constant 0 : i32
    %c0_i32_0 = arith.constant 0 : i32
    %c0_i32_1 = arith.constant 0 : i32
    return %c0_i32, %c0_i32_0 : i32, i32
  }
  func.func @transform_2(%arg0: i32) -> (i32, i32) {
    %c0_i32 = arith.constant 0 : i32
    %c0_i32_0 = arith.constant 0 : i32
    %c0_i32_1 = arith.constant 0 : i32
    return %c0_i32, %c0_i32_0 : i32, i32
  }
  func.func @transform_3(%arg0: i32) -> (i32, i32) {
    %c0_i32 = arith.constant 0 : i32
    %c0_i32_0 = arith.constant 0 : i32
    %c0_i32_1 = arith.constant 0 : i32
    return %c0_i32, %c0_i32_0 : i32, i32
  }
  func.func @transform_4(%arg0: i32) -> (i32, i32) {
    %c0_i32 = arith.constant 0 : i32
    %c0_i32_0 = arith.constant 0 : i32
    %c0_i32_1 = arith.constant 0 : i32
    return %c0_i32, %c0_i32_0 : i32, i32
  }
  func.func @transform_5(%arg0: i32) -> (i32, i32) {
    %c0_i32 = arith.constant 0 : i32
    %c0_i32_0 = arith.constant 0 : i32
    %c0_i32_1 = arith.constant 0 : i32
    return %c0_i32, %c0_i32_0 : i32, i32
  }
  func.func @transform_6(%arg0: i32) -> (i32, i32) {
    %c0_i32 = arith.constant 0 : i32
    %c0_i32_0 = arith.constant 0 : i32
    %c0_i32_1 = arith.constant 0 : i32
    return %c0_i32, %c0_i32_0 : i32, i32
  }
  func.func @transform_7(%arg0: i32) -> (i32, i32) {
    %c0_i32 = arith.constant 0 : i32
    %c0_i32_0 = arith.constant 0 : i32
    return %arg0, %c0_i32 : i32, i32
  }
}

</mosaic_0001>

<bundles_post_ra>
// kernel: tpu_custom_call.1
= control target key start
LH: loop header
LB: loop body
LE: loop exit
PB: predicated region body
PF: predicated region fallthrough
CT: control target
= control target key end

     0   :  { %v422_v3 = vmov 0.0|0.0   ;;  %vm423_vm0 = vmmov 0   ;;  %v424_v6 = vmov 0.0   ;;  %s543_s0 = inlined_call_operand.vmem [shape: f32[8,32], index: 0, kind: input, shape index: {}]   ;;  %s544_s1 = inlined_call_operand.vmem [shape: f32[32,64], index: 1, kind: input, shape index: {}]   ;;  %s545_s2 = inlined_call_operand.vmem [shape: f32[1,64], index: 2, kind: input, shape index: {}]   ;;  %s546_s3 = inlined_call_operand.vmem [shape: f32[64,32], index: 3, kind: input, shape index: {}]   ;;  %s547_s4 = inlined_call_operand.vmem [shape: f32[1,32], index: 4, kind: input, shape index: {}]   ;;  %s548_s5 = inlined_call_operand.vmem [shape: f32[32,16], index: 5, kind: input, shape index: {}]   ;;  %s549_s6 = inlined_call_operand.vmem [shape: f32[1,16], index: 6, kind: input, shape index: {}]   ;;  %s550_s7 = inlined_call_operand.hbm [shape: f32[8,16], index: 7, kind: output, shape index: {}]  }
   0x1   :  { %v28_v0 = vld [vmem:[%s544_s1] sm:$0xff]  ;;  %v29_v1 = vld [vmem:[%s544_s1 + $0x8] sm:$0xff]  ;;  %v30_v2 = vld [vmem:[%s544_s1 + $0x10] sm:$0xff]  ;;  %370 = vmatprep.subr.bf16.mxu0 %v422_v3  ;;  %337 = vmatprep.mubr.msk.f32.mxu0 %vm423_vm0, %v424_v6 }
   0x2   :  { %v371_v4 = vpack.c.bf16 %v29_v1, %v28_v0  ;;  %v31_v5 = vld [vmem:[%s544_s1 + $0x18] sm:$0xff]  ;;  %v114_v7 = vld [vmem:[%s546_s3] sm:$0xff]  ;;  %376 = vmatprep.subr.bf16.mxu1 %v422_v3  ;;  %v115_v8 = vld [vmem:[%s546_s3 + $0x8] sm:$0xff]  ;;  %356 = vmatprep.mubr.msk.f32.mxu1 %vm423_vm0, %v424_v6 }
   0x3   :  { %v116_v9 = vld [vmem:[%s546_s3 + $0x10] sm:$0xff]  ;;  %v117_v10 = vld [vmem:[%s546_s3 + $0x18] sm:$0xff]  ;;  %v374_v11 = vpack.c.bf16 %v31_v5, %v30_v2  ;;  %v377_v12 = vpack.c.bf16 %v115_v8, %v114_v7 }
   0x4   :  { %372 = vmatpush3.bf16.msra.mxu0 %v371_v4 }
   0x5   :  { %373 = vmatprep.subr.bf16.mxu0 %v422_v3 }
   0x6   :  { %12 = vsyncpa [#allocation3], 0  ;;  %378 = vmatpush3.bf16.msra.mxu1 %v377_v12  ;;  %v380_v13 = vpack.c.bf16 %v117_v10, %v116_v9  ;;  %v118_v14 = vld [vmem:[%s546_s3 + $0x20] sm:$0xff]  ;;  %v119_v15 = vld [vmem:[%s546_s3 + $0x28] sm:$0xff]  ;;  %vm39_vm1 = vcmask 261120   ;;  %vm129_vm2 = vcmask 523264  }
   0x7   :  { %379 = vmatprep.subr.bf16.mxu1 %v422_v3  ;;  %v27_v16 = vld [vmem:[%s543_s0] sm:$0xff]  ;;  %v383_v17 = vpack.c.bf16 %v119_v15, %v118_v14  ;;  %v120_v18 = vld [vmem:[%s546_s3 + $0x30] sm:$0xff]  ;;  %v121_v19 = vld [vmem:[%s546_s3 + $0x38] sm:$0xff]  ;;  %s425_s14 = smov [#allocation2]   ;;  %vm288_vm3 = vcmask 130048  }
   0x8   :  { %375 = vmatpush3.bf16.msra.mxu0 %v374_v11  ;;  %v386_v20 = vpack.c.bf16 %v121_v19, %v120_v18  ;;  %v204_v21 = vld [vmem:[%s548_s5] sm:$0xff]  ;;  %v205_v22 = vld [vmem:[%s548_s5 + $0x8] sm:$0xff]  ;;  %v206_v29 = vld [vmem:[%s548_s5 + $0x10] sm:$0xff]  ;;  %s296_s15 = sshll.u32 %s425_s14, 4  ;;  %s297_s15 = int_to_ptr.vmem [resolvable:$true] %s296_s15 }
   0x9   :  { %388 = vmatprep.subr.bf16.mxu0 %v422_v3  ;;  %v389_v23 = vpack.c.bf16 %v205_v22, %v204_v21  ;;  %v304_v24 = vld [vmem:[%s545_s2] ss:$0 sm:$0xff]  ;;  %v207_v30 = vld [vmem:[%s548_s5 + $0x18] sm:$0xff]  ;;  %s398_s5 = scalar_lea.vmem %s297_s15, 128  ;;  %p403_p1 = scmp.lt.s32.totalorder %s297_s15, %s297_s15 }
   0xa   :  { %381 = vmatpush3.bf16.msra.mxu1 %v380_v13  ;;  %v392_v31 = vpack.c.bf16 %v207_v30, %v206_v29  ;;  %v306_v32 = vld [vmem:[%s547_s4] ss:$0 sm:$0xff]  ;;  %p399_p0 = scmp.ne.s32.totalorder %s297_s15, %s398_s5  ;;  %p404_p2 = scmp.lt.s32.totalorder %s398_s5, %s398_s5 }
   0xb   :  { %338 = vmatmul.mubr.msk.f32.vlgmr.msra.gmra.mrb[0].mxu0 %vm39_vm1, %v27_v16  ;;  %382 = vmatprep.subr.bf16.mxu1 %v422_v3  ;;  %v308_v37 = vld [vmem:[%s549_s6] ss:$0 sm:$0xff] }
   0xc   :  { %367 = vmatprep.mubr.msk.f32.mxu0 %vm423_vm0, %v424_v6  ;;  %390 = vmatpush3.bf16.msra.mxu0 %v389_v23  ;;  %p405_p3 = por %p404_p2, %p403_p1 }
   0xd   :  { %391 = vmatprep.subr.bf16.mxu0 %v422_v3 }
   0xe   :  { %384 = vmatpush3.bf16.msra.mxu1 %v383_v17  ;;  %p406_p4 = pnand %p405_p3, %p399_p0 }
   0xf   :  { %385 = vmatprep.subr.bf16.mxu1 %v422_v3 }
  0x10   :  { %393 = vmatpush3.bf16.msra.mxu0 %v392_v31 }
  0x12   :  { %387 = vmatpush3.bf16.msra.mxu1 %v386_v20 }
  0xde   :  { %v109_v25 = vpop.f32.mrb[0].mxu0 }
  0xdf   :  { %v110_v26 = vadd.f32 %v304_v24, %v109_v25  ;;  %v339_v27 = vpop.f32.mrb[1].mxu0 }
  0xe1   :  { %v113_v28 = vmax.f32 %v110_v26, 0.0 }
  0xe3   :  { %357 = vmatmul.mubr.msk.f32.vlgmr.msra.gmra.mrb[0].mxu1 %vm129_vm2, %v113_v28 }
 0x1b6   :  { %v199_v33 = vpop.f32.mrb[0].mxu1 }
 0x1b7   :  { %v200_v34 = vadd.f32 %v306_v32, %v199_v33  ;;  %v358_v35 = vpop.f32.mrb[1].mxu1 }
 0x1b9   :  { %v203_v36 = vmax.f32 %v200_v34, 0.0 }
 0x1bb   :  { %368 = vmatmul.mubr.msk.f32.vlgmr.msra.gmra.mrb[2].mxu0 %vm39_vm1, %v203_v36 }
 0x28e   :  { %v284_v38 = vpop.f32.mrb[2].mxu0 }
 0x28f   :  { %v285_v39 = vadd.f32 %v308_v37, %v284_v38  ;;  %v369_v40 = vpop.f32.mrb[3].mxu0 }
 0x291   :  { %289 = vst.msk [vmem:[#allocation2] sm:$0xff] %vm288_vm3, %v285_v39 }
 0x292   :  { %409 = shalt.err (!%p406_p4)
}
 0x293   :  { %s410_s1 = scalar_lea.hbm %s550_s7, 128 }
 0x294   :  { %p411_p5 = scmp.ne.s32.totalorder %s550_s7, %s410_s1  ;;  %p414_p6 = scmp.lt.u32.totalorder %s410_s1, %s550_s7 }
 0x296   :  { %p416_p7 = pnand %p414_p6, %p411_p5 }
 0x298   :  { %419 = shalt.err (!%p416_p7)
}
 0x299   :  { %299 = dma.vmem_to_hbm [thread:$0]  %s297_s15, 128, %s550_s7, [#allocation3]  }
 0x29a   :  { %420 = dma.done.wait [#allocation3], 128  }
 0x29b   :  { %421 = vsyncadd [#allocation3], 4294967168 }
 0x29c   :  { %303 = vsyncpa [#allocation3], 1 }

</bundles_post_ra>
